<compile_context>
chip_gen: v5e
topology: v5e:2x2
jax: 0.10.0
libtpu: 0.0.40
codegen_flags: <defaults>
</compile_context>

<pallas_src>
import jax
import jax.numpy as jnp
from jax.experimental import pallas as pl
from jax.experimental.pallas import tpu as pltpu

# ----------------------------- model config ---------------------------------
B_TILE = 8             # rows per grid step == the module's batch_size
NUM_TILES = 4          # micro-batches fused into one pallas_call
TOTAL_BATCH = B_TILE * NUM_TILES
N_USERS = 16
N_ITEMS = 256          # lane-aligned (multiple of 128)
K_SIZE = 128           # lane-aligned hidden size (module default is 100)
CORRUPT_RATIO = 0.5
BN_EPS = 1e-5

# keep an element iff its uint32 random draw >= p * 2^32   (P(keep) = 1 - p)
_DROP_THRESHOLD = min(int(CORRUPT_RATIO * (1 << 32)), (1 << 32) - 1)


# ------------------------------ Pallas kernel --------------------------------
def cdae_kernel(uid_ref,       # SMEM (total_batch,) int32   (scalar prefetch)
                x_ref,         # VMEM (B_TILE, n_items) f32   interaction rows
                rbits_ref,     # VMEM (B_TILE, n_items) u32   dropout bits
                gamma_ref,     # VMEM (1, n_items) f32        BN weight
                beta_ref,      # VMEM (1, n_items) f32        BN bias
                wenc_ref,      # VMEM (n_items, k) bf16       encoder W (pre-T)
                benc_ref,      # VMEM (1, k) f32              encoder bias
                emb_ref,       # VMEM (n_users, 1, k) f32     user embedding table
                wdec_ref,      # VMEM (k, n_items) bf16       decoder W (pre-T)
                bdec_ref,      # VMEM (1, n_items) f32        decoder bias
                out_ref,       # VMEM (B_TILE, n_items) f32
                emb_scr):      # VMEM scratch (B_TILE, k) f32
    i = pl.program_id(0)
    x = x_ref[...]

    # ---- dropout (training): keep w.p. (1-p) via integer threshold, scale 1/(1-p)
    keep = rbits_ref[...] >= jnp.uint32(_DROP_THRESHOLD)
    x = jnp.where(keep, x * (1.0 / (1.0 - CORRUPT_RATIO)), jnp.zeros_like(x))

    # ---- BatchNorm1d over this micro-batch (training-mode stats, biased var)
    #      one-pass variance: mean(x^2) - mean^2
    mean = jnp.mean(x, axis=0, keepdims=True)
    var = jnp.maximum(jnp.mean(x * x, axis=0, keepdims=True) - mean * mean, 0.0)
    xn = (x - mean) * jax.lax.rsqrt(var + BN_EPS)
    xn = xn * gamma_ref[...] + beta_ref[...]

    # ---- fused user-embedding gather (ids scalar-prefetched in SMEM)
    for b in range(B_TILE):
        uid = uid_ref[i * B_TILE + b]
        emb_scr[pl.ds(b, 1), :] = emb_ref[uid]          # (1, k) row

    # ---- encoder Linear (bf16 MXU, f32 accumulate) + embedding + sigmoid
    h = jnp.dot(xn.astype(jnp.bfloat16), wenc_ref[...],
                preferred_element_type=jnp.float32)
    h = jax.nn.sigmoid(h + benc_ref[...] + emb_scr[...])

    # ---- decoder Linear (bf16 MXU, f32 accumulate) + sigmoid
    y = jnp.dot(h.astype(jnp.bfloat16), wdec_ref[...],
                preferred_element_type=jnp.float32)
    out_ref[...] = jax.nn.sigmoid(y + bdec_ref[...])


# ------------------------------ JAX wrapper ----------------------------------
@jax.jit
def cdae_forward(user_id, interaction_matrix, params, dropout_key):
    """user_id: (total_batch,) int32; interaction_matrix: (total_batch, n_items)."""
    total_b, n_items = interaction_matrix.shape
    k = params["w_enc"].shape[1]
    n_users = params["user_emb"].shape[0]
    assert total_b % B_TILE == 0
    num_tiles = total_b // B_TILE

    # dropout randomness generated host-side (portable to interpret mode)
    rbits = jax.random.bits(dropout_key, (total_b, n_items), jnp.uint32)
    emb_tbl = params["user_emb"].reshape(n_users, 1, k)

    grid_spec = pltpu.PrefetchScalarGridSpec(
        num_scalar_prefetch=1,               # user_id -> SMEM
        grid=(num_tiles,),
        in_specs=[
            pl.BlockSpec((B_TILE, n_items), lambda i, uid: (i, 0)),   # x
            pl.BlockSpec((B_TILE, n_items), lambda i, uid: (i, 0)),   # rbits
            pl.BlockSpec((1, n_items),      lambda i, uid: (0, 0)),   # gamma
            pl.BlockSpec((1, n_items),      lambda i, uid: (0, 0)),   # beta
            pl.BlockSpec((n_items, k),      lambda i, uid: (0, 0)),   # w_enc
            pl.BlockSpec((1, k),            lambda i, uid: (0, 0)),   # b_enc
            pl.BlockSpec((n_users, 1, k),   lambda i, uid: (0, 0, 0)),# emb table
            pl.BlockSpec((k, n_items),      lambda i, uid: (0, 0)),   # w_dec
            pl.BlockSpec((1, n_items),      lambda i, uid: (0, 0)),   # b_dec
        ],
        out_specs=pl.BlockSpec((B_TILE, n_items), lambda i, uid: (i, 0)),
        scratch_shapes=[pltpu.VMEM((B_TILE, k), jnp.float32)],
    )

    out = pl.pallas_call(
        cdae_kernel,
        out_shape=jax.ShapeDtypeStruct((total_b, n_items), jnp.float32),
        grid_spec=grid_spec,
        compiler_params=pltpu.CompilerParams(
            dimension_semantics=("parallel",),        # megacore-shard batch tiles
            vmem_limit_bytes=64 * 1024 * 1024,
        ),
    )(user_id.astype(jnp.int32),
      interaction_matrix.astype(jnp.float32),
      rbits,
      params["bn_gamma"], params["bn_beta"],
      params["w_enc"].astype(jnp.bfloat16), params["b_enc"],
      emb_tbl,
      params["w_dec"].astype(jnp.bfloat16), params["b_dec"])
    return out


# --------------------------- deterministic init -------------------------------
def init_params(key, n_users, n_items, k_size):
    keys = jax.random.split(key, 5)
    # nn.Embedding default init: N(0, 1)
    user_emb = jax.random.normal(keys[0], (n_users, k_size), jnp.float32)
    # BatchNorm1d affine: weight=1, bias=0
    bn_gamma = jnp.ones((1, n_items), jnp.float32)
    bn_beta = jnp.zeros((1, n_items), jnp.float32)
    # nn.Linear default init: U(-1/sqrt(fan_in), 1/sqrt(fan_in)); stored pre-transposed
    lim_e = 1.0 / jnp.sqrt(jnp.float32(n_items))
    w_enc = jax.random.uniform(keys[1], (n_items, k_size), jnp.float32, -lim_e, lim_e)
    b_enc = jax.random.uniform(keys[2], (1, k_size), jnp.float32, -lim_e, lim_e)
    lim_d = 1.0 / jnp.sqrt(jnp.float32(k_size))
    w_dec = jax.random.uniform(keys[3], (k_size, n_items), jnp.float32, -lim_d, lim_d)
    b_dec = jax.random.uniform(keys[4], (1, n_items), jnp.float32, -lim_d, lim_d)
    return dict(user_emb=user_emb, bn_gamma=bn_gamma, bn_beta=bn_beta,
                w_enc=w_enc, b_enc=b_enc, w_dec=w_dec, b_dec=b_dec)


# --------------------------------- main ---------------------------------------
if __name__ == "__main__":
    key = jax.random.PRNGKey(0)
    k_params, k_x, k_uid, k_drop = jax.random.split(key, 4)

    params = init_params(k_params, N_USERS, N_ITEMS, K_SIZE)

    # synthetic sparse-ish binary interaction matrix (4 micro-batches of 8 users)
    interaction_matrix = (
        jax.random.uniform(k_x, (TOTAL_BATCH, N_ITEMS), jnp.float32) < 0.1
    ).astype(jnp.float32)
    user_id = jax.random.randint(k_uid, (TOTAL_BATCH,), 0, N_USERS, dtype=jnp.int32)

    out = cdae_forward(user_id, interaction_matrix, params, k_drop)
    out = jax.block_until_ready(out)

    assert out.shape == (TOTAL_BATCH, N_ITEMS)
    assert bool(jnp.all(jnp.isfinite(out)))
    assert bool(jnp.all((out >= 0.0) & (out <= 1.0)))   # sigmoid output range
    print("KERNEL_OK")
</pallas_src>

<mosaic_0001>
module attributes {stable_mosaic.version = 11 : i64} {
  func.func @cdae_kernel(%arg0: i32, %arg1: memref<32xi32, #tpu.memory_space<smem>>, %arg2: memref<8x256xf32, #tpu.memory_space<vmem>>, %arg3: memref<8x256xi32, #tpu.memory_space<vmem>>, %arg4: memref<1x256xf32, #tpu.memory_space<vmem>>, %arg5: memref<1x256xf32, #tpu.memory_space<vmem>>, %arg6: memref<256x128xbf16, #tpu.memory_space<vmem>>, %arg7: memref<1x128xf32, #tpu.memory_space<vmem>>, %arg8: memref<16x1x128xf32, #tpu.memory_space<vmem>>, %arg9: memref<128x256xbf16, #tpu.memory_space<vmem>>, %arg10: memref<1x256xf32, #tpu.memory_space<vmem>>, %arg11: memref<8x256xf32, #tpu.memory_space<vmem>>, %arg12: memref<8x128xf32, #tpu.memory_space<vmem>>) attributes {dimension_semantics = [#tpu.dimension_semantics<parallel>], iteration_bounds = array<i64: 4>, scalar_prefetch = 1 : i64, scratch_operands = 1 : i64, tpu.core_type = #tpu.core_type<tc>, window_params = [{transform_indices = @transform_0, window_bounds = array<i64: 8, 256>}, {transform_indices = @transform_1, window_bounds = array<i64: 8, 256>}, {pipeline_mode = #tpu.pipeline_mode<synchronous>, transform_indices = @transform_2, window_bounds = array<i64: 1, 256>}, {pipeline_mode = #tpu.pipeline_mode<synchronous>, transform_indices = @transform_3, window_bounds = array<i64: 1, 256>}, {pipeline_mode = #tpu.pipeline_mode<synchronous>, transform_indices = @transform_4, window_bounds = array<i64: 256, 128>}, {pipeline_mode = #tpu.pipeline_mode<synchronous>, transform_indices = @transform_5, window_bounds = array<i64: 1, 128>}, {pipeline_mode = #tpu.pipeline_mode<synchronous>, transform_indices = @transform_6, window_bounds = array<i64: 16, 1, 128>}, {pipeline_mode = #tpu.pipeline_mode<synchronous>, transform_indices = @transform_7, window_bounds = array<i64: 128, 256>}, {pipeline_mode = #tpu.pipeline_mode<synchronous>, transform_indices = @transform_8, window_bounds = array<i64: 1, 256>}, {transform_indices = @transform_9, window_bounds = array<i64: 8, 256>}]} {
    %c0 = arith.constant 0 : index
    %c0_0 = arith.constant 0 : index
    %0 = vector.load %arg2[%c0, %c0_0] : memref<8x256xf32, #tpu.memory_space<vmem>>, vector<8x256xf32>
    %c0_1 = arith.constant 0 : index
    %c0_2 = arith.constant 0 : index
    %1 = vector.load %arg3[%c0_1, %c0_2] : memref<8x256xi32, #tpu.memory_space<vmem>>, vector<8x256xi32>
    %c-2147483648_i32 = arith.constant -2147483648 : i32
    %2 = vector.broadcast %c-2147483648_i32 : i32 to vector<8x256xi32>
    %3 = arith.cmpi uge, %1, %2 : vector<8x256xi32>
    %cst = arith.constant 2.000000e+00 : f32
    %4 = vector.broadcast %cst : f32 to vector<8x256xf32>
    %5 = arith.mulf %0, %4 : vector<8x256xf32>
    %cst_3 = arith.constant 0.000000e+00 : f32
    %6 = vector.broadcast %cst_3 : f32 to vector<8x256xf32>
    %7 = arith.select %3, %5, %6 : vector<8x256xi1>, vector<8x256xf32>
    %cst_4 = arith.constant dense<0.000000e+00> : vector<256xf32>
    %8 = vector.multi_reduction <add>, %7, %cst_4 [0] : vector<8x256xf32> to vector<256xf32>
    %9 = vector.shape_cast %8 : vector<256xf32> to vector<1x256xf32>
    %cst_5 = arith.constant 8.000000e+00 : f32
    %10 = vector.broadcast %cst_5 : f32 to vector<1x256xf32>
    %11 = arith.divf %9, %10 : vector<1x256xf32>
    %12 = arith.mulf %7, %7 : vector<8x256xf32>
    %cst_6 = arith.constant dense<0.000000e+00> : vector<256xf32>
    %13 = vector.multi_reduction <add>, %12, %cst_6 [0] : vector<8x256xf32> to vector<256xf32>
    %14 = vector.shape_cast %13 : vector<256xf32> to vector<1x256xf32>
    %cst_7 = arith.constant 8.000000e+00 : f32
    %15 = vector.broadcast %cst_7 : f32 to vector<1x256xf32>
    %16 = arith.divf %14, %15 : vector<1x256xf32>
    %17 = arith.mulf %11, %11 : vector<1x256xf32>
    %18 = arith.subf %16, %17 : vector<1x256xf32>
    %cst_8 = arith.constant 0.000000e+00 : f32
    %19 = vector.broadcast %cst_8 : f32 to vector<1x256xf32>
    %20 = arith.maximumf %18, %19 : vector<1x256xf32>
    %21 = vector.broadcast %11 : vector<1x256xf32> to vector<8x256xf32>
    %22 = arith.subf %7, %21 : vector<8x256xf32>
    %cst_9 = arith.constant 9.99999974E-6 : f32
    %23 = vector.broadcast %cst_9 : f32 to vector<1x256xf32>
    %24 = arith.addf %20, %23 : vector<1x256xf32>
    %25 = math.rsqrt %24 : vector<1x256xf32>
    %26 = vector.broadcast %25 : vector<1x256xf32> to vector<8x256xf32>
    %27 = arith.mulf %22, %26 : vector<8x256xf32>
    %c0_10 = arith.constant 0 : index
    %c0_11 = arith.constant 0 : index
    %28 = vector.load %arg4[%c0_10, %c0_11] : memref<1x256xf32, #tpu.memory_space<vmem>>, vector<1x256xf32>
    %29 = vector.broadcast %28 : vector<1x256xf32> to vector<8x256xf32>
    %30 = arith.mulf %27, %29 : vector<8x256xf32>
    %c0_12 = arith.constant 0 : index
    %c0_13 = arith.constant 0 : index
    %31 = vector.load %arg5[%c0_12, %c0_13] : memref<1x256xf32, #tpu.memory_space<vmem>>, vector<1x256xf32>
    %32 = vector.broadcast %31 : vector<1x256xf32> to vector<8x256xf32>
    %33 = arith.addf %30, %32 : vector<8x256xf32>
    %c8_i32 = arith.constant 8 : i32
    %34 = arith.muli %arg0, %c8_i32 : i32
    %c0_i32 = arith.constant 0 : i32
    %35 = arith.addi %34, %c0_i32 : i32
    %36 = arith.index_cast %35 : i32 to index
    %37 = memref.load %arg1[%36] : memref<32xi32, #tpu.memory_space<smem>>
    %38 = arith.index_cast %37 : i32 to index
    %c0_14 = arith.constant 0 : index
    %c0_15 = arith.constant 0 : index
    %39 = vector.load %arg8[%38, %c0_14, %c0_15] : memref<16x1x128xf32, #tpu.memory_space<vmem>>, vector<1x1x128xf32>
    %40 = vector.shape_cast %39 : vector<1x1x128xf32> to vector<1x128xf32>
    %c0_16 = arith.constant 0 : index
    %c0_17 = arith.constant 0 : index
    %41 = vector.load %arg12[%c0_16, %c0_17] : memref<8x128xf32, #tpu.memory_space<vmem>>, vector<1x128xf32>
    tpu.vector_store %arg12[%c0_16, %c0_17], %40 {strides = array<i32>} : memref<8x128xf32, #tpu.memory_space<vmem>>, vector<1x128xf32>,
    %c8_i32_18 = arith.constant 8 : i32
    %42 = arith.muli %arg0, %c8_i32_18 : i32
    %c1_i32 = arith.constant 1 : i32
    %43 = arith.addi %42, %c1_i32 : i32
    %44 = arith.index_cast %43 : i32 to index
    %45 = memref.load %arg1[%44] : memref<32xi32, #tpu.memory_space<smem>>
    %46 = arith.index_cast %45 : i32 to index
    %c0_19 = arith.constant 0 : index
    %c0_20 = arith.constant 0 : index
    %47 = vector.load %arg8[%46, %c0_19, %c0_20] : memref<16x1x128xf32, #tpu.memory_space<vmem>>, vector<1x1x128xf32>
    %48 = vector.shape_cast %47 : vector<1x1x128xf32> to vector<1x128xf32>
    %c1 = arith.constant 1 : index
    %c0_21 = arith.constant 0 : index
    %49 = vector.load %arg12[%c1, %c0_21] : memref<8x128xf32, #tpu.memory_space<vmem>>, vector<1x128xf32>
    tpu.vector_store %arg12[%c1, %c0_21], %48 {strides = array<i32>} : memref<8x128xf32, #tpu.memory_space<vmem>>, vector<1x128xf32>,
    %c8_i32_22 = arith.constant 8 : i32
    %50 = arith.muli %arg0, %c8_i32_22 : i32
    %c2_i32 = arith.constant 2 : i32
    %51 = arith.addi %50, %c2_i32 : i32
    %52 = arith.index_cast %51 : i32 to index
    %53 = memref.load %arg1[%52] : memref<32xi32, #tpu.memory_space<smem>>
    %54 = arith.index_cast %53 : i32 to index
    %c0_23 = arith.constant 0 : index
    %c0_24 = arith.constant 0 : index
    %55 = vector.load %arg8[%54, %c0_23, %c0_24] : memref<16x1x128xf32, #tpu.memory_space<vmem>>, vector<1x1x128xf32>
    %56 = vector.shape_cast %55 : vector<1x1x128xf32> to vector<1x128xf32>
    %c2 = arith.constant 2 : index
    %c0_25 = arith.constant 0 : index
    %57 = vector.load %arg12[%c2, %c0_25] : memref<8x128xf32, #tpu.memory_space<vmem>>, vector<1x128xf32>
    tpu.vector_store %arg12[%c2, %c0_25], %56 {strides = array<i32>} : memref<8x128xf32, #tpu.memory_space<vmem>>, vector<1x128xf32>,
    %c8_i32_26 = arith.constant 8 : i32
    %58 = arith.muli %arg0, %c8_i32_26 : i32
    %c3_i32 = arith.constant 3 : i32
    %59 = arith.addi %58, %c3_i32 : i32
    %60 = arith.index_cast %59 : i32 to index
    %61 = memref.load %arg1[%60] : memref<32xi32, #tpu.memory_space<smem>>
    %62 = arith.index_cast %61 : i32 to index
    %c0_27 = arith.constant 0 : index
    %c0_28 = arith.constant 0 : index
    %63 = vector.load %arg8[%62, %c0_27, %c0_28] : memref<16x1x128xf32, #tpu.memory_space<vmem>>, vector<1x1x128xf32>
    %64 = vector.shape_cast %63 : vector<1x1x128xf32> to vector<1x128xf32>
    %c3 = arith.constant 3 : index
    %c0_29 = arith.constant 0 : index
    %65 = vector.load %arg12[%c3, %c0_29] : memref<8x128xf32, #tpu.memory_space<vmem>>, vector<1x128xf32>
    tpu.vector_store %arg12[%c3, %c0_29], %64 {strides = array<i32>} : memref<8x128xf32, #tpu.memory_space<vmem>>, vector<1x128xf32>,
    %c8_i32_30 = arith.constant 8 : i32
    %66 = arith.muli %arg0, %c8_i32_30 : i32
    %c4_i32 = arith.constant 4 : i32
    %67 = arith.addi %66, %c4_i32 : i32
    %68 = arith.index_cast %67 : i32 to index
    %69 = memref.load %arg1[%68] : memref<32xi32, #tpu.memory_space<smem>>
    %70 = arith.index_cast %69 : i32 to index
    %c0_31 = arith.constant 0 : index
    %c0_32 = arith.constant 0 : index
    %71 = vector.load %arg8[%70, %c0_31, %c0_32] : memref<16x1x128xf32, #tpu.memory_space<vmem>>, vector<1x1x128xf32>
    %72 = vector.shape_cast %71 : vector<1x1x128xf32> to vector<1x128xf32>
    %c4 = arith.constant 4 : index
    %c0_33 = arith.constant 0 : index
    %73 = vector.load %arg12[%c4, %c0_33] : memref<8x128xf32, #tpu.memory_space<vmem>>, vector<1x128xf32>
    tpu.vector_store %arg12[%c4, %c0_33], %72 {strides = array<i32>} : memref<8x128xf32, #tpu.memory_space<vmem>>, vector<1x128xf32>,
    %c8_i32_34 = arith.constant 8 : i32
    %74 = arith.muli %arg0, %c8_i32_34 : i32
    %c5_i32 = arith.constant 5 : i32
    %75 = arith.addi %74, %c5_i32 : i32
    %76 = arith.index_cast %75 : i32 to index
    %77 = memref.load %arg1[%76] : memref<32xi32, #tpu.memory_space<smem>>
    %78 = arith.index_cast %77 : i32 to index
    %c0_35 = arith.constant 0 : index
    %c0_36 = arith.constant 0 : index
    %79 = vector.load %arg8[%78, %c0_35, %c0_36] : memref<16x1x128xf32, #tpu.memory_space<vmem>>, vector<1x1x128xf32>
    %80 = vector.shape_cast %79 : vector<1x1x128xf32> to vector<1x128xf32>
    %c5 = arith.constant 5 : index
    %c0_37 = arith.constant 0 : index
    %81 = vector.load %arg12[%c5, %c0_37] : memref<8x128xf32, #tpu.memory_space<vmem>>, vector<1x128xf32>
    tpu.vector_store %arg12[%c5, %c0_37], %80 {strides = array<i32>} : memref<8x128xf32, #tpu.memory_space<vmem>>, vector<1x128xf32>,
    %c8_i32_38 = arith.constant 8 : i32
    %82 = arith.muli %arg0, %c8_i32_38 : i32
    %c6_i32 = arith.constant 6 : i32
    %83 = arith.addi %82, %c6_i32 : i32
    %84 = arith.index_cast %83 : i32 to index
    %85 = memref.load %arg1[%84] : memref<32xi32, #tpu.memory_space<smem>>
    %86 = arith.index_cast %85 : i32 to index
    %c0_39 = arith.constant 0 : index
    %c0_40 = arith.constant 0 : index
    %87 = vector.load %arg8[%86, %c0_39, %c0_40] : memref<16x1x128xf32, #tpu.memory_space<vmem>>, vector<1x1x128xf32>
    %88 = vector.shape_cast %87 : vector<1x1x128xf32> to vector<1x128xf32>
    %c6 = arith.constant 6 : index
    %c0_41 = arith.constant 0 : index
    %89 = vector.load %arg12[%c6, %c0_41] : memref<8x128xf32, #tpu.memory_space<vmem>>, vector<1x128xf32>
    tpu.vector_store %arg12[%c6, %c0_41], %88 {strides = array<i32>} : memref<8x128xf32, #tpu.memory_space<vmem>>, vector<1x128xf32>,
    %c8_i32_42 = arith.constant 8 : i32
    %90 = arith.muli %arg0, %c8_i32_42 : i32
    %c7_i32 = arith.constant 7 : i32
    %91 = arith.addi %90, %c7_i32 : i32
    %92 = arith.index_cast %91 : i32 to index
    %93 = memref.load %arg1[%92] : memref<32xi32, #tpu.memory_space<smem>>
    %94 = arith.index_cast %93 : i32 to index
    %c0_43 = arith.constant 0 : index
    %c0_44 = arith.constant 0 : index
    %95 = vector.load %arg8[%94, %c0_43, %c0_44] : memref<16x1x128xf32, #tpu.memory_space<vmem>>, vector<1x1x128xf32>
    %96 = vector.shape_cast %95 : vector<1x1x128xf32> to vector<1x128xf32>
    %c7 = arith.constant 7 : index
    %c0_45 = arith.constant 0 : index
    %97 = vector.load %arg12[%c7, %c0_45] : memref<8x128xf32, #tpu.memory_space<vmem>>, vector<1x128xf32>
    tpu.vector_store %arg12[%c7, %c0_45], %96 {strides = array<i32>} : memref<8x128xf32, #tpu.memory_space<vmem>>, vector<1x128xf32>,
    %98 = arith.truncf %33 : vector<8x256xf32> to vector<8x256xbf16>
    %c0_46 = arith.constant 0 : index
    %c0_47 = arith.constant 0 : index
    %99 = vector.load %arg6[%c0_46, %c0_47] : memref<256x128xbf16, #tpu.memory_space<vmem>>, vector<256x128xbf16>
    %cst_48 = arith.constant dense<0.000000e+00> : vector<8x128xf32>
    %100 = tpu.matmul %98, %99, %cst_48 {dimension_numbers = #tpu.dot_dimension_numbers<[1], [0], [0], [1], [0, 0, 1, 1], [], []>} : vector<8x256xbf16>, vector<256x128xbf16>, vector<8x128xf32> -> vector<8x128xf32>
    %c0_49 = arith.constant 0 : index
    %c0_50 = arith.constant 0 : index
    %101 = vector.load %arg7[%c0_49, %c0_50] : memref<1x128xf32, #tpu.memory_space<vmem>>, vector<1x128xf32>
    %102 = vector.broadcast %101 : vector<1x128xf32> to vector<8x128xf32>
    %103 = arith.addf %100, %102 : vector<8x128xf32>
    %c0_51 = arith.constant 0 : index
    %c0_52 = arith.constant 0 : index
    %104 = vector.load %arg12[%c0_51, %c0_52] : memref<8x128xf32, #tpu.memory_space<vmem>>, vector<8x128xf32>
    %105 = arith.addf %103, %104 : vector<8x128xf32>
    %106 = arith.negf %105 : vector<8x128xf32>
    %107 = math.exp %106 : vector<8x128xf32>
    %cst_53 = arith.constant 1.000000e+00 : f32
    %108 = vector.broadcast %cst_53 : f32 to vector<8x128xf32>
    %109 = arith.addf %108, %107 : vector<8x128xf32>
    %110 = arith.divf %108, %109 : vector<8x128xf32>
    %111 = arith.truncf %110 : vector<8x128xf32> to vector<8x128xbf16>
    %c0_54 = arith.constant 0 : index
    %c0_55 = arith.constant 0 : index
    %112 = vector.load %arg9[%c0_54, %c0_55] : memref<128x256xbf16, #tpu.memory_space<vmem>>, vector<128x256xbf16>
    %cst_56 = arith.constant dense<0.000000e+00> : vector<8x256xf32>
    %113 = tpu.matmul %111, %112, %cst_56 {dimension_numbers = #tpu.dot_dimension_numbers<[1], [0], [0], [1], [0, 0, 1, 1], [], []>} : vector<8x128xbf16>, vector<128x256xbf16>, vector<8x256xf32> -> vector<8x256xf32>
    %c0_57 = arith.constant 0 : index
    %c0_58 = arith.constant 0 : index
    %114 = vector.load %arg10[%c0_57, %c0_58] : memref<1x256xf32, #tpu.memory_space<vmem>>, vector<1x256xf32>
    %115 = vector.broadcast %114 : vector<1x256xf32> to vector<8x256xf32>
    %116 = arith.addf %113, %115 : vector<8x256xf32>
    %117 = arith.negf %116 : vector<8x256xf32>
    %118 = math.exp %117 : vector<8x256xf32>
    %cst_59 = arith.constant 1.000000e+00 : f32
    %119 = vector.broadcast %cst_59 : f32 to vector<8x256xf32>
    %120 = arith.addf %119, %118 : vector<8x256xf32>
    %121 = arith.divf %119, %120 : vector<8x256xf32>
    %c0_60 = arith.constant 0 : index
    %c0_61 = arith.constant 0 : index
    %122 = vector.load %arg11[%c0_60, %c0_61] : memref<8x256xf32, #tpu.memory_space<vmem>>, vector<8x256xf32>
    tpu.vector_store %arg11[%c0_60, %c0_61], %121 {strides = array<i32>} : memref<8x256xf32, #tpu.memory_space<vmem>>, vector<8x256xf32>,
    return
  }
  func.func @transform_0(%arg0: i32, %arg1: memref<32xi32, #tpu.memory_space<smem>>) -> (i32, i32) {
    %c0_i32 = arith.constant 0 : i32
    %c0_i32_0 = arith.constant 0 : i32
    return %arg0, %c0_i32 : i32, i32
  }
  func.func @transform_1(%arg0: i32, %arg1: memref<32xi32, #tpu.memory_space<smem>>) -> (i32, i32) {
    %c0_i32 = arith.constant 0 : i32
    %c0_i32_0 = arith.constant 0 : i32
    return %arg0, %c0_i32 : i32, i32
  }
  func.func @transform_2(%arg0: i32, %arg1: memref<32xi32, #tpu.memory_space<smem>>) -> (i32, i32) {
    %c0_i32 = arith.constant 0 : i32
    %c0_i32_0 = arith.constant 0 : i32
    %c0_i32_1 = arith.constant 0 : i32
    return %c0_i32, %c0_i32_0 : i32, i32
  }
  func.func @transform_3(%arg0: i32, %arg1: memref<32xi32, #tpu.memory_space<smem>>) -> (i32, i32) {
    %c0_i32 = arith.constant 0 : i32
    %c0_i32_0 = arith.constant 0 : i32
    %c0_i32_1 = arith.constant 0 : i32
    return %c0_i32, %c0_i32_0 : i32, i32
  }
  func.func @transform_4(%arg0: i32, %arg1: memref<32xi32, #tpu.memory_space<smem>>) -> (i32, i32) {
    %c0_i32 = arith.constant 0 : i32
    %c0_i32_0 = arith.constant 0 : i32
    %c0_i32_1 = arith.constant 0 : i32
    return %c0_i32, %c0_i32_0 : i32, i32
  }
  func.func @transform_5(%arg0: i32, %arg1: memref<32xi32, #tpu.memory_space<smem>>) -> (i32, i32) {
    %c0_i32 = arith.constant 0 : i32
    %c0_i32_0 = arith.constant 0 : i32
    %c0_i32_1 = arith.constant 0 : i32
    return %c0_i32, %c0_i32_0 : i32, i32
  }
  func.func @transform_6(%arg0: i32, %arg1: memref<32xi32, #tpu.memory_space<smem>>) -> (i32, i32, i32) {
    %c0_i32 = arith.constant 0 : i32
    %c0_i32_0 = arith.constant 0 : i32
    %c0_i32_1 = arith.constant 0 : i32
    %c0_i32_2 = arith.constant 0 : i32
    return %c0_i32, %c0_i32_0, %c0_i32_1 : i32, i32, i32
  }
  func.func @transform_7(%arg0: i32, %arg1: memref<32xi32, #tpu.memory_space<smem>>) -> (i32, i32) {
    %c0_i32 = arith.constant 0 : i32
    %c0_i32_0 = arith.constant 0 : i32
    %c0_i32_1 = arith.constant 0 : i32
    return %c0_i32, %c0_i32_0 : i32, i32
  }
  func.func @transform_8(%arg0: i32, %arg1: memref<32xi32, #tpu.memory_space<smem>>) -> (i32, i32) {
    %c0_i32 = arith.constant 0 : i32
    %c0_i32_0 = arith.constant 0 : i32
    %c0_i32_1 = arith.constant 0 : i32
    return %c0_i32, %c0_i32_0 : i32, i32
  }
  func.func @transform_9(%arg0: i32, %arg1: memref<32xi32, #tpu.memory_space<smem>>) -> (i32, i32) {
    %c0_i32 = arith.constant 0 : i32
    %c0_i32_0 = arith.constant 0 : i32
    return %arg0, %c0_i32 : i32, i32
  }
}

</mosaic_0001>

<bundles_post_ra>
// kernel: cdae_forward.1
= control target key start
LH: loop header
LB: loop body
LE: loop exit
PB: predicated region body
PF: predicated region fallthrough
CT: control target
= control target key end

     0   :  { %s1266_s16 = smov [#allocation4]   ;;  %s1613_s0 = inlined_call_operand.vmem [shape: s32[32], index: 0, kind: input, shape index: {}]   ;;  %s1614_s1 = inlined_call_operand.vmem [shape: f32[32,256], index: 1, kind: input, shape index: {}]   ;;  %s1615_s2 = inlined_call_operand.vmem [shape: u32[32,256], index: 2, kind: input, shape index: {}]   ;;  %s1616_s3 = inlined_call_operand.vmem [shape: f32[1,256], index: 3, kind: input, shape index: {}]   ;;  %s1617_s4 = inlined_call_operand.vmem [shape: f32[1,256], index: 4, kind: input, shape index: {}]   ;;  %s1618_s5 = inlined_call_operand.vmem [shape: bf16[256,128], index: 5, kind: input, shape index: {}]   ;;  %s1619_s6 = inlined_call_operand.vmem [shape: f32[1,128], index: 6, kind: input, shape index: {}]   ;;  %s1620_s7 = inlined_call_operand.vmem [shape: f32[16,1,128], index: 7, kind: input, shape index: {}]   ;;  %s1621_s8 = inlined_call_operand.vmem [shape: bf16[128,256], index: 8, kind: input, shape index: {}]   ;;  %s1622_s9 = inlined_call_operand.vmem [shape: f32[1,256], index: 9, kind: input, shape index: {}]   ;;  %s1623_s10 = inlined_call_operand.hbm [shape: f32[32,256], index: 10, kind: output, shape index: {}]  }
   0x1   :  { %1632 = sst [smem:[#allocation16_spill]] %s1614_s1  ;;  %s16_s15 = sshll.u32 %s1613_s0, 4  ;;  %s17_s15 = int_to_ptr.vmem [resolvable:$true] %s16_s15 }
   0x2   :  { %1633 = sst [smem:[#allocation17_spill]] %s1615_s2 }
   0x3   :  { %1634 = sst [smem:[#allocation18_spill]] %s1616_s3 }
   0x4   :  { %1635 = sst [smem:[#allocation19_spill]] %s1617_s4 }
   0x5   :  { %1636 = sst [smem:[#allocation20_spill]] %s1618_s5 }
   0x6   :  { %19 = dma.vmem_to_smem %s17_s15, 16, %s1266_s16, [#allocation3] }
   0x7   :  { %1244 = dma.done.wait [#allocation3], 16 }
   0x8   :  { %1245 = vsyncadd [#allocation3], 4294967280 }
   0x9   :  { %22 = sfence }
   0xa   :  { %23 = vsyncpa [#allocation6], 0 }
   0xb   :  { %25 = vsyncpa [#allocation6 + $0x1], 0  ;;  %s1326_s17 = smov 0   ;;  %s1328_s18 = smov 0  }
   0xc   :  { %s1330_s19 = smov 0   ;;  %s1332_s20 = smov 0  }
   0xd LB: > { %1637 = sst [smem:[#allocation9_spill]] %s1252_s17  ;;  %s1347_s0 = sadd.s32 4294967295, %s1264_s20   ;;  %s1264_s20 = sphi %s1332_s20, %s1655_s20   ;;  %s1260_s19 = sphi %s1330_s19, %s1657_s19   ;;  %s1256_s18 = sphi %s1328_s18, %s1659_s18   ;;  %s1252_s17 = sphi %s1326_s17, %s1658_s17  }
   0xe   : > { %1638 = sst [smem:[#allocation10_spill]] %s1260_s19  ;;  %s945_s21 = sadd.s32 4294967294, %s1264_s20  }
   0xf   : > { %1639 = sst [smem:[#allocation11_spill]] %s1264_s20  ;;  %s1351_s22 = sadd.s32 1, %s1264_s20  }
  0x10   : > { %1640 = sst [smem:[#allocation12_spill]] %s1351_s22  ;;  %s237_s23 = sadd.s32 1, %s1260_s19 }
  0x11   : > { %s234_s24 = ssub.s32 %s1264_s20, %s1351_s22  ;;  %p247_p0 = scmp.ne.s32.totalorder %s1260_s19, %s1256_s18 }
  0x12   : > { %p235_p1 = scmp.eq.s32.totalorder %s234_s24, 0  ;;  %p248_p2 = scmp.eq.s32.totalorder %s1347_s0, 3 }
  0x13   : > { %p253_p3 = scmp.ne.s32.totalorder %s1256_s18, %s1252_s17  ;;  %p254_p4 = scmp.eq.s32.totalorder %s945_s21, 3 }
  0x14   : > { %s1362_s25 = scalar_select %p235_p1, %s1260_s19, %s237_s23  }
  0x15   : > { %p1364_p5 = por %p248_p2, %p247_p0  ;;  %p1368_p6 = por %p254_p4, %p253_p3 }
  0x16   : > { %1641 = sst [smem:[#allocation13_spill]] %s1362_s25  ;;  %p948_p7 = scmp.ge.s32.totalorder %s1264_s20, 1 }
  0x17   : > { %s1642_s26 = scalar_select %p1364_p5, 1, 0 }
  0x18   : > { %s1644_s27 = scalar_select %p1368_p6, 1, 0 }
  0x19   : > { %1643 = sst [smem:[#allocation14_spill]] %s1642_s26  ;;  %p309_p8 = scmp.lt.s32.totalorder %s1264_s20, 5 }
  0x1a   : > { %1645 = sst [smem:[#allocation15_spill]] %s1644_s27 }
  0x1b   : > { %p310_p9 = pnand %p948_p7, %p309_p8 }
  0x1c   : > { %s1646_s5 = sld [smem:[#allocation20_spill]] (!%p310_p9)  ;;  %p350_p10 = scmp.lt.s32.totalorder (!%p310_p9), %s1347_s0, 3 }
  0x1d   : > { %313 = sbr.rel (%p310_p9) target bundleno = 420 (0x1a4), region = 56  ;;  %s1647_s1 = sld [smem:[#allocation16_spill]] (!%p310_p9) }
  0x1e   : > { %s1648_s2 = sld [smem:[#allocation17_spill]] (!%p310_p9)  ;;  %s956_s30 = sshll.u32 (!%p310_p9), %s1347_s0, 3 }
  0x1f   : > { %s1649_s3 = sld [smem:[#allocation18_spill]] (!%p310_p9)  ;;  %s464_s11 = sadd.s32 (!%p310_p9), 1, %s956_s30 }
  0x20   : > { %s1650_s4 = sld [smem:[#allocation19_spill]] (!%p310_p9)  ;;  %s469_s12 = sadd.s32 (!%p310_p9), 2, %s956_s30 }
  0x21   : > { %s460_s13 = sld [smem:[#allocation4 + %s956_s30]] (!%p310_p9)  ;;  %s474_s14 = sadd.s32 (!%p310_p9), 3, %s956_s30 }
  0x22   : > { %v1102_v0 = vld [vmem:[%s1646_s5 + $0x38] sm:$0xff]  ;;  %v1267_v2 = vmov 8.0   ;;  %v1101_v3 = vld [vmem:[%s1646_s5 + $0x30] sm:$0xff]  ;;  %s351_s16 = scalar_select %p350_p10, %s1347_s0, 3  ;;  %v1100_v5 = vld [vmem:[%s1646_s5 + $0x28] sm:$0xff] }
  0x23   : > { %v1110_v1 = vld [vmem:[%s1646_s5 + $0x78] sm:$0xff]  ;;  %1170 = vrcp.f32 %v1267_v2  ;;  %633 = vmatpush.bf16.msra.mxu0 %v1102_v0  ;;  %v1109_v4 = vld [vmem:[%s1646_s5 + $0x70] sm:$0xff]  ;;  %v1108_v6 = vld [vmem:[%s1646_s5 + $0x68] sm:$0xff]  ;;  %s465_s15 = sld [smem:[#allocation4 + %s464_s11]]  ;;  %s489_s23 = sadd.s32 6, %s956_s30 }
  0x24   : > { %646 = vmatpush.bf16.msra.mxu1 %v1110_v1  ;;  %s1093_s21 = sshll.u32 %s351_s16, 4  ;;  %v1099_v17 = vld [vmem:[%s1646_s5 + $0x20] sm:$0xff]  ;;  %v1098_v29 = vld [vmem:[%s1646_s5 + $0x18] sm:$0xff]  ;;  %v1097_v40 = vld [vmem:[%s1646_s5 + $0x10] sm:$0xff]  ;;  %s479_s16 = sadd.s32 4, %s956_s30 }
  0x25   : > { %s354_s25 = scalar_lea.vmem %s1647_s1, %s1093_s21  ;;  %s359_s19 = scalar_lea.vmem %s1648_s2, %s1093_s21  ;;  %v1107_v18 = vld [vmem:[%s1646_s5 + $0x60] sm:$0xff]  ;;  %v1106_v30 = vld [vmem:[%s1646_s5 + $0x58] sm:$0xff]  ;;  %v1105_v41 = vld [vmem:[%s1646_s5 + $0x50] sm:$0xff] }
  0x26   : > { %v360_v7 = vld [vmem:[%s354_s25] sm:$0xff]  ;;  %v361_v9 = vld [vmem:[%s354_s25 + $0x8] sm:$0xff]  ;;  %s470_s21 = sld [smem:[#allocation4 + %s469_s12]]  ;;  %s494_s28 = sadd.s32 7, %s956_s30 }
  0x27   : > { %634 = vmatpush.bf16.msra.mxu0 %v1101_v3  ;;  %v362_v8 = vld [vmem:[%s359_s19] sm:$0xff]  ;;  %v370_v12 = vmul.f32 2.0, %v360_v7  ;;  %v363_v13 = vld [vmem:[%s359_s19 + $0x8] sm:$0xff]  ;;  %v371_v14 = vmul.f32 2.0, %v361_v9  ;;  %s484_s19 = sadd.s32 5, %s956_s30  ;;  %s475_s25 = sld [smem:[#allocation4 + %s474_s14]] }
  0x28   : > { %647 = vmatpush.bf16.msra.mxu1 %v1109_v4  ;;  %v954_v11 = vxor.u32 2147483648, %v362_v8  ;;  %v955_v16 = vxor.u32 2147483648, %v363_v13  ;;  %v1096_v51 = vld [vmem:[%s1646_s5 + $0x8] sm:$0xff]  ;;  %v1095_v61 = vld [vmem:[%s1646_s5] sm:$0xff]  ;;  %s480_s24 = sld [smem:[#allocation4 + %s479_s16]]  ;;  %s1220_s14 = scalar_lea.hbm %s1623_s10, 64 }
  0x29   : > { %v1171_v10 = vpop.eup %1170  ;;  %v1104_v52 = vld [vmem:[%s1646_s5 + $0x48] sm:$0xff]  ;;  %v1103_v62 = vld [vmem:[%s1646_s5 + $0x40] sm:$0xff]  ;;  %s485_s29 = sld [smem:[#allocation4 + %s484_s19]]  ;;  %s461_s5 = scalar_lea.vmem %s1620_s7, %s460_s13 }
  0x2a   : > { %v387_v15 = vmul.f32 8.0, %v1171_v10  ;;  %vm366_vm0 = vcmp.ge.s32.totalorder %v954_v11, 0  ;;  %vm369_vm1 = vcmp.ge.s32.totalorder %v955_v16, 0  ;;  %vm391_vm2 = vweird.f32 %v1171_v10  ;;  %v443_v16 = vld [vmem:[%s1649_s3] sm:$0x3]  ;;  %s490_s1 = sld [smem:[#allocation4 + %s489_s23]]  ;;  %s466_s17 = scalar_lea.vmem %s1620_s7, %s465_s15 }
  0x2b   : > { %635 = vmatpush.bf16.msra.mxu0 %v1100_v5  ;;  %v1406_v19 = vsel %vm366_vm0, %v370_v12, 0.0  ;;  %v1411_v23 = vsel %vm369_vm1, %v371_v14, 0.0  ;;  %s495_s2 = sld [smem:[#allocation4 + %s494_s28]]  ;;  %s1127_s15 = sshll.u32 %s1347_s0, 4 }
  0x2c   : > { %648 = vmatpush.bf16.msra.mxu1 %v1108_v6  ;;  %v388_v20 = vsub.f32 1.0, %v387_v15  ;;  %v374_v21 = vrot.slane %v1406_v19, 4  ;;  %v395_v22 = vmul.f32 %v1406_v19, %v1406_v19  ;;  %v380_v25 = vrot.slane %v1411_v23, 4  ;;  %s471_s12 = scalar_lea.vmem %s1620_s7, %s470_s21 }
  0x2d   : > { %v396_v26 = vmul.f32 %v1411_v23, %v1411_v23  ;;  %s476_s16 = scalar_lea.vmem %s1620_s7, %s475_s25 }
  0x2e   : > { %v389_v24 = vmul.f32 %v1171_v10, %v388_v20  ;;  %v375_v27 = vadd.f32 %v374_v21, %v1406_v19  ;;  %v397_v28 = vrot.slane %v395_v22, 4  ;;  %v381_v31 = vadd.f32 %v380_v25, %v1411_v23  ;;  %v451_v21 = vld [vmem:[%s1650_s4] sm:$0x3]  ;;  %s481_s23 = scalar_lea.vmem %s1620_s7, %s480_s24 }
  0x2f   : > { %636 = vmatpush.bf16.msra.mxu0 %v1099_v17  ;;  %v403_v32 = vrot.slane %v396_v26, 4  ;;  %s486_s22 = scalar_lea.vmem %s1620_s7, %s485_s29 }
  0x30   : > { %649 = vmatpush.bf16.msra.mxu1 %v1107_v18  ;;  %v376_v33 = vrot.slane %v375_v27, 2  ;;  %v398_v34 = vadd.f32 %v397_v28, %v395_v22  ;;  %v390_v35 = vadd.f32 %v1171_v10, %v389_v24  ;;  %v382_v36 = vrot.slane %v381_v31, 2  ;;  %s491_s13 = scalar_lea.vmem %s1620_s7, %s490_s1 }
  0x31   : > { %v404_v37 = vadd.f32 %v403_v32, %v396_v26  ;;  %v445_v24 = vperm.slane %v443_v16, 0  ;;  %s496_s21 = scalar_lea.vmem %s1620_s7, %s495_s2 }
  0x32   : > { %v377_v38 = vadd.f32 %v376_v33, %v375_v27  ;;  %v399_v39 = vrot.slane %v398_v34, 2  ;;  %v383_v42 = vadd.f32 %v382_v36, %v381_v31  ;;  %v392_v46 = vsel %vm391_vm2, %v1171_v10, %v390_v35 }
  0x33   : > { %637 = vmatpush.bf16.msra.mxu0 %v1098_v29  ;;  %v405_v43 = vrot.slane %v404_v37, 2  ;;  %v446_v27 = vperm.slane %v443_v16, 1  ;;  %v453_v29 = vperm.slane %v451_v21, 0 }
  0x34   : > { %650 = vmatpush.bf16.msra.mxu1 %v1106_v30  ;;  %v378_v44 = vrot.slane %v377_v38, 1  ;;  %v400_v45 = vadd.f32 %v399_v39, %v398_v34  ;;  %v384_v47 = vrot.slane %v383_v42, 1  ;;  %v472_v39 = vld [vmem:[%s471_s12] sm:$0x1] }
  0x35   : > { %v406_v48 = vadd.f32 %v405_v43, %v404_v37  ;;  %473 = vst [vmem:[#allocation2 + $0x2] sm:$0x1] %v472_v39  ;;  %v492_v43 = vld [vmem:[%s491_s13] sm:$0x1]  ;;  %s347_s13 = sand.u32 1, %s1256_s18  }
  0x36   : > { %v379_v49 = vadd.f32 %v378_v44, %v377_v38  ;;  %v401_v50 = vrot.slane %v400_v45, 1  ;;  %v385_v53 = vadd.f32 %v384_v47, %v383_v42  ;;  %v467_v38 = vld [vmem:[%s466_s17] sm:$0x1]  ;;  %493 = vst [vmem:[#allocation2 + $0x6] sm:$0x1] %v492_v43  ;;  %s949_s26 = sshll.u32 %s347_s13, 4  ;;  %s861_s17 = scalar_lea.hbm %s1623_s10, %s1127_s15 }
  0x37   : > { %638 = vmatpush.bf16.msra.mxu0 %v1097_v40  ;;  %v407_v54 = vrot.slane %v406_v48, 1  ;;  %v477_v40 = vld [vmem:[%s476_s16] sm:$0x1]  ;;  %468 = vst [vmem:[#allocation2 + $0x1] sm:$0x1] %v467_v38  ;;  %s349_s25 = scalar_lea.vmem [#allocation5], %s949_s26 }
  0x38   : > { %651 = vmatpush.bf16.msra.mxu1 %v1105_v41  ;;  %v393_v55 = vmul.f32 %v392_v46, %v379_v49  ;;  %v402_v56 = vadd.f32 %v401_v50, %v400_v45  ;;  %v394_v57 = vmul.f32 %v392_v46, %v385_v53  ;;  %v482_v41 = vld [vmem:[%s481_s23] sm:$0x1]  ;;  %478 = vst [vmem:[#allocation2 + $0x3] sm:$0x1] %v477_v40  ;;  %v1080_v45 = vld [vmem:[%s1621_s8 + $0x70] sm:$0xf] }
  0x39   : > { %v408_v58 = vadd.f32 %v407_v54, %v406_v48  ;;  %v487_v42 = vld [vmem:[%s486_s22] sm:$0x1]  ;;  %483 = vst [vmem:[#allocation2 + $0x4] sm:$0x1] %v482_v41  ;;  %v1125_v48 = vld [vmem:[%s1621_s8 + $0x74] sm:$0xf] }
  0x3a   : > { %v409_v59 = vmul.f32 %v402_v56, %v392_v46  ;;  %v411_v60 = vmul.f32 %v393_v55, %v393_v55  ;;  %v412_v0 = vmul.f32 %v394_v57, %v394_v57  ;;  %v417_v17 = vsub.f32 %v1406_v19, %v393_v55  ;;  %v497_v44 = vld [vmem:[%s496_s21] sm:$0x1]  ;;  %488 = vst [vmem:[#allocation2 + $0x5] sm:$0x1] %v487_v42  ;;  %v1082_v49 = vld [vmem:[%s1621_s8 + $0x78] sm:$0xf0] }
  0x3b   : > { %639 = vmatpush.bf16.msra.mxu0 %v1096_v51  ;;  %v410_v63 = vmul.f32 %v408_v58, %v392_v46  ;;  %v418_v22 = vsub.f32 %v1411_v23, %v394_v57  ;;  %v454_v19 = vperm.slane %v451_v21, 1  ;;  %v462_v23 = vld [vmem:[%s461_s5] sm:$0x1]  ;;  %v1126_v46 = vld [vmem:[%s1621_s8 + $0x74] sm:$0xf0]  ;;  %v1085_v50 = vor.u32 %v1125_v48, %v1082_v49  ;;  %s863_s1 = sshll.u32 %s349_s25, 4  ;;  %s864_s1 = int_to_ptr.vmem [resolvable:$true] %s863_s1 }
  0x3c   : > { %652 = vmatpush.bf16.msra.mxu1 %v1104_v52  ;;  %v413_v1 = vsub.f32 %v409_v59, %v411_v60  ;;  %463 = vst [vmem:[#allocation2] sm:$0x1] %v462_v23  ;;  %v1081_v47 = vor.u32 %v1126_v46, %v1080_v45  ;;  %v1072_v51 = vld [vmem:[%s1621_s8 + $0x60] sm:$0xf]  ;;  %v1124_v52 = vld [vmem:[%s1621_s8 + $0x64] sm:$0xf0] }
  0x3d   : > { %v414_v2 = vsub.f32 %v410_v63, %v412_v0  ;;  %498 = vst [vmem:[#allocation2 + $0x7] sm:$0x1] %v497_v44  ;;  %796 = vmatpush.bf16.msra.mxu3 %v1085_v50  ;;  %v1123_v53 = vld [vmem:[%s1621_s8 + $0x64] sm:$0xf]  ;;  %v1073_v54 = vor.u32 %v1124_v52, %v1072_v51  ;;  %v1074_v55 = vld [vmem:[%s1621_s8 + $0x68] sm:$0xf0] }
  0x3e   : > { %v415_v3 = vmax.f32 %v413_v1, 0.0  ;;  %783 = vmatpush.bf16.msra.mxu2 %v1081_v47  ;;  %v1077_v56 = vor.u32 %v1123_v53, %v1074_v55  ;;  %v1064_v57 = vld [vmem:[%s1621_s8 + $0x50] sm:$0xf]  ;;  %v1122_v58 = vld [vmem:[%s1621_s8 + $0x54] sm:$0xf0]  ;;  %s865_s0 = sshll.u32 %s861_s17, 4  ;;  %s866_s0 = int_to_ptr.hbm [resolvable:$true] %s865_s0 }
  0x3f   : > { %640 = vmatpush.bf16.msra.mxu0 %v1095_v61  ;;  %v416_v4 = vmax.f32 %v414_v2, 0.0  ;;  %v1065_v59 = vor.u32 %v1122_v58, %v1064_v57  ;;  %v1121_v60 = vld [vmem:[%s1621_s8 + $0x54] sm:$0xf]  ;;  %v1066_v61 = vld [vmem:[%s1621_s8 + $0x58] sm:$0xf0]  ;;  %s850_s2 = scalar_lea.sflag [#allocation6], %s347_s13 }
  0x40   : > { %653 = vmatpush.bf16.msra.mxu1 %v1103_v62  ;;  %v419_v5 = vadd.f32 1e-05, %v415_v3  ;;  %v1069_v62 = vor.u32 %v1121_v60, %v1066_v61  ;;  %v1056_v63 = vld [vmem:[%s1621_s8 + $0x40] sm:$0xf]  ;;  %v1120_v0 = vld [vmem:[%s1621_s8 + $0x44] sm:$0xf0] }
  0x41   : > { %v420_v6 = vadd.f32 1e-05, %v416_v4  ;;  %797 = vmatpush.bf16.msra.mxu3 %v1077_v56  ;;  %v1119_v1 = vld [vmem:[%s1621_s8 + $0x44] sm:$0xf]  ;;  %v1057_v2 = vor.u32 %v1120_v0, %v1056_v63  ;;  %v1058_v3 = vld [vmem:[%s1621_s8 + $0x48] sm:$0xf0] }
  0x42   : > { %1172 = vrsqrt.f32 %v419_v5  ;;  %vm427_vm3 = vweird.f32 %v419_v5  ;;  %784 = vmatpush.bf16.msra.mxu2 %v1073_v54  ;;  %v1061_v4 = vor.u32 %v1119_v1, %v1058_v3  ;;  %v1034_v21 = vld [vmem:[%s1621_s8 + $0x18] sm:$0xf0]  ;;  %v697_v52 = vld [vmem:[%s1622_s9] sm:$0x3]  ;;  %s1214_s28 = sshra.s32 %s866_s0, 4  ;;  %s1215_s28 = int_to_ptr.hbm [resolvable:$true] %s1214_s28 }
  0x43   : > { %1174 = vrsqrt.f32 %v420_v6  ;;  %vm437_vm5 = vweird.f32 %v420_v6  ;;  %v699_v53 = vperm.slane %v697_v52, 0  ;;  %v700_v54 = vperm.slane %v697_v52, 1  ;;  %s1216_s29 = scalar_lea.hbm %s1215_s28, 16  ;;  %p1221_p0 = scmp.lt.s32.totalorder %s1215_s28, %s1623_s10 }
  0x44   : > { %p1217_p11 = scmp.ne.s32.totalorder %s1215_s28, %s1216_s29  ;;  %p1222_p1 = scmp.lt.s32.totalorder %s1220_s14, %s1216_s29 }
  0x45   : > { %798 = vmatpush.bf16.msra.mxu3 %v1069_v62 }
  0x46   : > { %785 = vmatpush.bf16.msra.mxu2 %v1065_v59  ;;  %p1218_p12 = pnand %p1217_p11, %p1364_p5  ;;  %p1223_p2 = por %p1222_p1, %p1221_p0 }
  0x48   : > { %v1173_v7 = vpop.eup %1172  ;;  %p1219_p13 = pneg %p1218_p12 }
  0x49   : > { %v1175_v8 = vpop.eup %1174  ;;  %v422_v9 = vmul.f32 %v1173_v7, %v419_v5  ;;  %vm428_vm4 = vweird.f32 %v1173_v7  ;;  %v1048_v5 = vld [vmem:[%s1621_s8 + $0x30] sm:$0xf]  ;;  %799 = vmatpush.bf16.msra.mxu3 %v1061_v4 }
  0x4a   : > { %v432_v10 = vmul.f32 %v1175_v8, %v420_v6  ;;  %vm438_vm6 = vweird.f32 %v1175_v8  ;;  %vm429_vm7 = vmor %vm427_vm3, %vm428_vm4  ;;  %v1118_v6 = vld [vmem:[%s1621_s8 + $0x34] sm:$0xf0]  ;;  %786 = vmatpush.bf16.msra.mxu2 %v1057_v2  ;;  %p1224_p3 = pnand %p1223_p2, %p1219_p13 }
  0x4b   : > { %v423_v11 = vmul.f32 %v1173_v7, %v422_v9  ;;  %vm439_vm8 = vmor %vm437_vm5, %vm438_vm6  ;;  %v1050_v9 = vld [vmem:[%s1621_s8 + $0x38] sm:$0xf0] }
  0x4c   : > { %v433_v12 = vmul.f32 %v1175_v8, %v432_v10 }
  0x4d   : > { %v424_v13 = vmul.f32 0.5, %v423_v11  ;;  %v1040_v11 = vld [vmem:[%s1621_s8 + $0x20] sm:$0xf] }
  0x4e   : > { %v434_v14 = vmul.f32 0.5, %v433_v12  ;;  %v1116_v12 = vld [vmem:[%s1621_s8 + $0x24] sm:$0xf0] }
  0x4f   : > { %v425_v15 = vsub.f32 1.5, %v424_v13  ;;  %v1115_v13 = vld [vmem:[%s1621_s8 + $0x24] sm:$0xf] }
  0x50   : > { %v435_v18 = vsub.f32 1.5, %v434_v14  ;;  %v1042_v14 = vld [vmem:[%s1621_s8 + $0x28] sm:$0xf0] }
  0x51   : > { %v426_v20 = vmul.f32 %v1173_v7, %v425_v15  ;;  %v1041_v15 = vor.u32 %v1116_v12, %v1040_v11  ;;  %v1045_v16 = vor.u32 %v1115_v13, %v1042_v14 }
  0x52   : > { %v436_v25 = vmul.f32 %v1175_v8, %v435_v18  ;;  %v1114_v18 = vld [vmem:[%s1621_s8 + $0x14] sm:$0xf0] }
  0x53   : > { %v430_v26 = vsel %vm429_vm7, %v1173_v7, %v426_v20  ;;  %v1117_v7 = vld [vmem:[%s1621_s8 + $0x34] sm:$0xf] }
  0x54   : > { %v441_v28 = vmul.f32 %v430_v26, %v417_v17  ;;  %v440_v30 = vsel %vm439_vm8, %v1175_v8, %v436_v25  ;;  %v1049_v8 = vor.u32 %v1118_v6, %v1048_v5  ;;  %v1053_v10 = vor.u32 %v1117_v7, %v1050_v9  ;;  %v1032_v17 = vld [vmem:[%s1621_s8 + $0x10] sm:$0xf]  ;;  %v1113_v20 = vld [vmem:[%s1621_s8 + $0x14] sm:$0xf]  ;;  %v1024_v25 = vld [vmem:[%s1621_s8] sm:$0xf] }
  0x55   : > { %v442_v31 = vmul.f32 %v440_v30, %v418_v22  ;;  %v1033_v22 = vor.u32 %v1114_v18, %v1032_v17  ;;  %v1112_v26 = vld [vmem:[%s1621_s8 + $0x4] sm:$0xf0] }
  0x56   : > { %v449_v32 = vmul.f32 %v445_v24, %v441_v28  ;;  %787 = vmatpush.bf16.msra.mxu2 %v1049_v8  ;;  %800 = vmatpush.bf16.msra.mxu3 %v1053_v10  ;;  %v1037_v24 = vor.u32 %v1113_v20, %v1034_v21  ;;  %v1111_v28 = vld [vmem:[%s1621_s8 + $0x4] sm:$0xf]  ;;  %v1025_v30 = vor.u32 %v1112_v26, %v1024_v25 }
  0x57   : > { %v450_v33 = vmul.f32 %v446_v27, %v442_v31  ;;  %v1169_v27 = vld [vmem:[%s1619_s6] ss:$0 sm:$0xff] }
  0x58   : > { %v457_v34 = vadd.f32 %v453_v29, %v449_v32  ;;  %v1026_v29 = vld [vmem:[%s1621_s8 + $0x8] sm:$0xf0] }
  0x59   : > { %v458_v35 = vadd.f32 %v454_v19, %v450_v33  ;;  %v1029_v19 = vor.u32 %v1111_v28, %v1026_v29 }
  0x5a   : > { %v499_v36 = vpack.c.bf16 %v457_v34, %v457_v34  ;;  %788 = vmatpush.bf16.msra.mxu2 %v1041_v15  ;;  %801 = vmatpush.bf16.msra.mxu3 %v1045_v16  ;;  %v659_v34 = vld [vmem:[#allocation2] sm:$0xff] }
  0x5b   : > { %v500_v37 = vpack.c.bf16 %v458_v35, %v458_v35 }
  0x5c   : > { %641 = vmatmul.bf16.vlgmr.msra.gmra.mxu0 %v499_v36 }
  0x5d   : > { %654 = vmatmul.bf16.vlgmr.msra.gmra.mxu1 %v500_v37 }
  0x5e   : > { %789 = vmatpush.bf16.msra.mxu2 %v1033_v22  ;;  %802 = vmatpush.bf16.msra.mxu3 %v1037_v24 }
  0x62   : > { %790 = vmatpush.bf16.msra.mxu2 %v1025_v30  ;;  %803 = vmatpush.bf16.msra.mxu3 %v1029_v19 }
  0xd9   : > { %v642_v31 = vpop.f32.mrf.mxu0 }
  0xda   : > { %v643_v32 = vadd.f32 %v1169_v27, %v642_v31  ;;  %v655_v33 = vpop.f32.mrf.mxu1 }
  0xdc   : > { %v656_v35 = vadd.f32 %v655_v33, %v643_v32 }
  0xde   : > { %v660_v36 = vadd.f32 %v659_v34, %v656_v35 }
  0xe0   : > { %v1021_v37 = vmul.f32 -1.442695, %v660_v36 }
  0xe1   : > { %v644_v23 = vpop.f32.mrf.mxu0 }
  0xe2   : > { %1176 = vpow2.f32 %v1021_v37  ;;  %v657_v38 = vpop.f32.mrf.mxu1 }
  0xe8   : > { %v1177_v39 = vpop.eup %1176 }
  0xe9   : > { %v664_v40 = vadd.f32 1.0, %v1177_v39 }
  0xeb   : > { %1178 = vrcp.f32 %v664_v40  ;;  %v676_v44 = vand.u32 2147483648, %v664_v40  ;;  %v674_v46 = vand.u32 2147483647, %v664_v40  ;;  %vm670_vm10 = vweird.f32 %v664_v40 }
  0xed   : > { %v677_v48 = vor.u32 1.1754944e-38, %v676_v44  ;;  %vm675_vm12 = vcmp.eq.f32.partialorder %v674_v46, 8.507059e+37 }
  0xf1   : > { %v1179_v41 = vpop.eup %1178 }
  0xf2   : > { %v666_v42 = vmul.f32 %v1179_v41, %v664_v40  ;;  %vm671_vm9 = vweird.f32 %v1179_v41 }
  0xf3   : > { %vm672_vm11 = vmor %vm670_vm10, %vm671_vm9 }
  0xf4   : > { %v667_v43 = vsub.f32 1.0, %v666_v42 }
  0xf6   : > { %v668_v45 = vmul.f32 %v1179_v41, %v667_v43 }
  0xf8   : > { %v669_v47 = vadd.f32 %v1179_v41, %v668_v45 }
  0xfa   : > { %v673_v49 = vsel %vm672_vm11, %v1179_v41, %v669_v47 }
  0xfb   : > { %v678_v50 = vsel %vm675_vm12, %v677_v48, %v673_v49 }
  0xfc   : > { %v680_v51 = vpack.c.bf16 %v678_v50, %v678_v50 }
  0xfe   : > { %791 = vmatmul.bf16.vlgmr.msra.gmra.mxu2 %v680_v51  ;;  %804 = vmatmul.bf16.vlgmr.msra.gmra.mxu3 %v680_v51 }
 0x181   : > { %v792_v55 = vpop.f32.mrf.mxu2  ;;  %v805_v56 = vpop.f32.mrf.mxu3 }
 0x182   : > { %v793_v57 = vadd.f32 %v792_v55, %v699_v53  ;;  %v806_v58 = vadd.f32 %v805_v56, %v700_v54 }
 0x184   : > { %v1086_v59 = vmul.f32 -1.442695, %v793_v57  ;;  %v1087_v60 = vmul.f32 -1.442695, %v806_v58 }
 0x186   : > { %1180 = vpow2.f32 %v1086_v59 }
 0x187   : > { %1182 = vpow2.f32 %v1087_v60 }
 0x189   : > { %v794_v61 = vpop.f32.mrf.mxu2  ;;  %v807_v62 = vpop.f32.mrf.mxu3 }
 0x18c   : > { %v1181_v63 = vpop.eup %1180 }
 0x18d   : > { %v1183_v0 = vpop.eup %1182  ;;  %v815_v1 = vadd.f32 1.0, %v1181_v63 }
 0x18e   : > { %v816_v2 = vadd.f32 1.0, %v1183_v0 }
 0x18f   : > { %1184 = vrcp.f32 %v815_v1  ;;  %v828_v9 = vand.u32 2147483648, %v815_v1  ;;  %v826_v11 = vand.u32 2147483647, %v815_v1  ;;  %vm822_vm15 = vweird.f32 %v815_v1 }
 0x190   : > { %1186 = vrcp.f32 %v816_v2  ;;  %v843_v12 = vand.u32 2147483648, %v816_v2  ;;  %v841_v14 = vand.u32 2147483647, %v816_v2  ;;  %vm837_vm1 = vweird.f32 %v816_v2 }
 0x191   : > { %v829_v16 = vor.u32 1.1754944e-38, %v828_v9  ;;  %vm827_vm2 = vcmp.eq.f32.partialorder %v826_v11, 8.507059e+37 }
 0x192   : > { %v844_v20 = vor.u32 1.1754944e-38, %v843_v12  ;;  %vm842_vm4 = vcmp.eq.f32.partialorder %v841_v14, 8.507059e+37 }
 0x195   : > { %v1185_v3 = vpop.eup %1184 }
 0x196   : > { %v1187_v4 = vpop.eup %1186  ;;  %v818_v5 = vmul.f32 %v1185_v3, %v815_v1  ;;  %vm823_vm13 = vweird.f32 %v1185_v3 }
 0x197   : > { %v833_v6 = vmul.f32 %v1187_v4, %v816_v2  ;;  %vm838_vm14 = vweird.f32 %v1187_v4  ;;  %vm824_vm0 = vmor %vm822_vm15, %vm823_vm13 }
 0x198   : > { %v819_v7 = vsub.f32 1.0, %v818_v5  ;;  %vm839_vm3 = vmor %vm837_vm1, %vm838_vm14 }
 0x199   : > { %v834_v8 = vsub.f32 1.0, %v833_v6 }
 0x19a   : > { %v820_v10 = vmul.f32 %v1185_v3, %v819_v7 }
 0x19b   : > { %v835_v13 = vmul.f32 %v1187_v4, %v834_v8 }
 0x19c   : > { %v821_v15 = vadd.f32 %v1185_v3, %v820_v10 }
 0x19d   : > { %v836_v17 = vadd.f32 %v1187_v4, %v835_v13 }
 0x19e   : > { %v825_v18 = vsel %vm824_vm0, %v1185_v3, %v821_v15 }
 0x19f   : > { %v830_v21 = vsel %vm827_vm2, %v829_v16, %v825_v18  ;;  %v840_v22 = vsel %vm839_vm3, %v1187_v4, %v836_v17 }
 0x1a0   : > { %v845_v24 = vsel %vm842_vm4, %v844_v20, %v840_v22  ;;  %847 = vst [vmem:[%s349_s25] sm:$0xff] %v830_v21 }
 0x1a1   : > { %848 = vst [vmem:[%s349_s25 + $0x8] sm:$0xff] %v845_v24 }
 0x1a2   : > { %1227 = shalt.err (!%p1224_p3)
}
 0x1a3   : > { %1128 = dma.vmem_to_hbm [thread:$0]  (%p1364_p5), %s864_s1, 256, %s866_s0, %s850_s2  }
 0x1a4 PF: > { %s1652_s19 = sld [smem:[#allocation11_spill]] }
 0x1a5   : > { %s1653_s23 = sld [smem:[#allocation9_spill]] }
 0x1aa   : > { %p1134_p4 = scmp.ge.s32.totalorder %s1652_s19, 2 }
 0x1ab   : > { %s877_s4 = sand.u32 1, %s1653_s23  }
 0x1ac   : > { %p1131_p7 = pnand %p1134_p4, %p1368_p6  ;;  %s878_s22 = scalar_lea.sflag [#allocation6], %s877_s4 }
 0x1ae   : > { %p1132_p8 = pneg %p1131_p7 }
 0x1b0   : > { %1247 = dma.done.wait (%p1132_p8), %s878_s22, 256  }
 0x1b1   : > { %1249 = vsyncadd (%p1132_p8), %s878_s22, 4294967040  ;;  %s1655_s20 = sld [smem:[#allocation12_spill]]  ;;  %s1658_s17 = smov %s1256_s18 }
 0x1b2   : > { %s1656_s27 = sld [smem:[#allocation10_spill]] }
 0x1b3   : > { %s1657_s19 = sld [smem:[#allocation13_spill]] }
 0x1b7   : > { %p28_p9 = scmp.ge.s32.totalorder %s1655_s20, 6  }
 0x1b8   : > { %s1659_s18 = smov %s1656_s27 }
 0x1b9   :  { %30 = sbr.rel (!%p28_p9) target bundleno = 13 (0xd), region = 102 }
 0x1be   :  { %884 = vsyncpa [#allocation6], 1 }
 0x1bf   :  { %886 = vsyncpa [#allocation6 + $0x1], 1 }

</bundles_post_ra>
